<compile_context>
chip_gen: v5e
topology: v5e:2x2
jax: 0.10.0
libtpu: 0.0.40
codegen_flags: <defaults>
</compile_context>

<pallas_src>
import jax
import jax.numpy as jnp
from jax.experimental import pallas as pl
from jax.experimental.pallas import tpu as pltpu


def _round_up(x, m):
    return (x + m - 1) // m * m


# ----------------------------------------------------------------------------
# Pallas kernel: fused-tap conv3d matmul (all conv FLOPs live here).
#   xt_ref: (27*Cin, M_tile) bf16  -- transposed im2col, M lane-dense
#   wt_ref: (Cout, 27*Cin)   bf16  -- resident across the whole grid
#   o_ref : (Cout, M_tile)   f32
# ----------------------------------------------------------------------------
def _fused_conv_kernel(xt_ref, wt_ref, o_ref):
    o_ref[...] = jnp.dot(wt_ref[...], xt_ref[...],
                         preferred_element_type=jnp.float32)


def fused_conv_matmul(xt, wt, *, m_tile):
    """xt: (K*Cin, M_pad) bf16, wt: (Cout, K*Cin) bf16 -> (Cout, M_pad) f32."""
    kc, m_pad = xt.shape
    cout = wt.shape[0]
    assert m_pad % m_tile == 0
    grid = (m_pad // m_tile,)
    return pl.pallas_call(
        _fused_conv_kernel,
        out_shape=jax.ShapeDtypeStruct((cout, m_pad), jnp.float32),
        grid_spec=pltpu.PrefetchScalarGridSpec(
            num_scalar_prefetch=0,
            grid=grid,
            in_specs=[
                pl.BlockSpec((kc, m_tile), lambda m: (0, m)),
                # Constant index_map -> weights fetched once, stay resident.
                pl.BlockSpec((cout, kc), lambda m: (0, 0)),
            ],
            out_specs=pl.BlockSpec((cout, m_tile), lambda m: (0, m)),
        ),
        compiler_params=pltpu.CompilerParams(
            dimension_semantics=("parallel",),
            vmem_limit_bytes=32 * 1024 * 1024),
    )(xt, wt)


# ----------------------------------------------------------------------------
# Glue: densify sparse input and build the fused (27*Cin, M) im2col.
# ----------------------------------------------------------------------------
def densify(features, coordinates, grid_shape, batch_size):
    # NOTE: duplicate (b,d,h,w) coordinates are last-write-wins (matches the
    # undefinedness of feeding duplicates to spconv); dedup upstream if needed.
    d, h, w = grid_shape
    c = features.shape[-1]
    dense = jnp.zeros((batch_size, d, h, w, c), jnp.float32)
    b, di, hi, wi = (coordinates[:, 0], coordinates[:, 1],
                     coordinates[:, 2], coordinates[:, 3])
    return dense.at[b, di, hi, wi].set(features.astype(jnp.float32))


def dense_conv3d(x, w, stride, padding, *, m_tile_max=1024):
    """x: (N, D, H, W, Cin), w: (3, 3, 3, Cin, Cout). No bias (matches module)."""
    n, d, h, wd, c = x.shape
    k = 3
    cout = w.shape[-1]
    xp = jnp.pad(x, ((0, 0), (padding, padding), (padding, padding),
                     (padding, padding), (0, 0)))
    dp, hp, wp = d + 2 * padding, h + 2 * padding, wd + 2 * padding
    do = (dp - k) // stride + 1
    ho = (hp - k) // stride + 1
    wo = (wp - k) // stride + 1

    # TODO(synk): the fused im2col below is still materialized in HBM (~27x the
    #   input read traffic); forming taps in-kernel from a (tile + halo) VMEM
    #   slab would cut HBM traffic to ~1x input.
    taps = []
    for kd in range(k):
        for kh in range(k):
            for kw in range(k):
                t = xp[:,
                       kd:kd + stride * (do - 1) + 1:stride,
                       kh:kh + stride * (ho - 1) + 1:stride,
                       kw:kw + stride * (wo - 1) + 1:stride, :]
                # (Cin, M) so the large M axis stays lane-dense in the kernel.
                taps.append(jnp.moveaxis(t, -1, 0).reshape(c, -1))
    xt = jnp.concatenate(taps, axis=0).astype(jnp.bfloat16)        # (27*Cin, M)
    wt = w.reshape(k * k * k * c, cout).T.astype(jnp.bfloat16)     # (Cout, 27*Cin)

    m = xt.shape[1]
    m_tile = min(m_tile_max, _round_up(m, 128))
    m_pad = _round_up(m, m_tile)
    if m_pad != m:
        xt = jnp.pad(xt, ((0, 0), (0, m_pad - m)))

    out_t = fused_conv_matmul(xt, wt, m_tile=m_tile)               # (Cout, M_pad)
    out = out_t[:, :m].T.reshape(n, do, ho, wo, cout)
    return out


# ----------------------------------------------------------------------------
# Pallas kernel: to_global (voxel index -> metric xyz), lane-dense layout.
# ----------------------------------------------------------------------------
def _to_global_kernel(idx_ref, scale_ref, off_ref, o_ref):
    # idx: (3, M) voxel indices; scale/off: (3, 1). M on the lane axis.
    o_ref[...] = idx_ref[...] * scale_ref[...] + off_ref[...]


def to_global_xyz(shape_dhw, voxel_size, voxel_offset, stride_level):
    # NOTE: mirrors the original module's to_global (index * voxel_size * 2^i +
    # offset); the original carries its own TODO about ijk vs xyz ordering.
    d, h, w = shape_dhw
    di, hi, wi = jnp.meshgrid(jnp.arange(d), jnp.arange(h), jnp.arange(w),
                              indexing="ij")
    idx = jnp.stack([di, hi, wi], axis=0).reshape(3, -1).astype(jnp.float32)
    m = idx.shape[1]
    m_pad = _round_up(m, 128)
    if m_pad != m:
        idx = jnp.pad(idx, ((0, 0), (0, m_pad - m)))
    scale = (voxel_size * (2.0 ** stride_level)).reshape(3, 1).astype(jnp.float32)
    off = voxel_offset.reshape(3, 1).astype(jnp.float32)
    xyz_t = pl.pallas_call(
        _to_global_kernel,
        out_shape=jax.ShapeDtypeStruct((3, m_pad), jnp.float32),
    )(idx, scale, off)
    return xyz_t[:, :m].T                                          # (M, 3)


# ----------------------------------------------------------------------------
# CNN_3D dense-equivalent wrapper.
# ----------------------------------------------------------------------------
class CNN3DPallas:
    def __init__(self, grid_shape, c_in, voxel_size, grid_bounds, key):
        keys = jax.random.split(key, 4)
        chans = [(c_in, 16), (16, 16), (16, 32), (32, 64)]
        self.weights = [
            jax.random.normal(kk, (3, 3, 3, ci, co), jnp.float32) * 0.05
            for kk, (ci, co) in zip(keys, chans)
        ]
        self.strides = [1, 2, 2, 2]
        self.paddings = [0, 1, 1, 1]
        self.grid_shape = grid_shape
        self.base_voxel_size = jnp.asarray(voxel_size, jnp.float32)
        self.voxel_offset = jnp.asarray(grid_bounds[:3], jnp.float32)

    def __call__(self, features, coordinates, batch_size):
        x = densify(features, coordinates, self.grid_shape, batch_size)
        vols = []
        for w, s, p in zip(self.weights, self.strides, self.paddings):
            x = dense_conv3d(x, w, s, p)
            vols.append(x)
        results = []
        for i, vol in enumerate(vols):          # strides 1x, 2x, 4x, 8x
            n, d_, h_, w_, c_ = vol.shape
            feat = vol.reshape(n, d_ * h_ * w_, c_)
            xyz = to_global_xyz((d_, h_, w_), self.base_voxel_size,
                                self.voxel_offset, i)
            results.append((feat, xyz))
        return results


if __name__ == "__main__":
    key = jax.random.PRNGKey(0)
    k_feat, k_coord, k_w = jax.random.split(key, 3)

    grid_shape = (16, 16, 16)   # small (D, H, W) toy grid
    C_in = 4
    batch_size = 2
    num_voxels = 64
    voxel_size = [0.05, 0.05, 0.1]
    grid_bounds = [0.0, -40.0, -3.0, 70.4, 40.0, 1.0]

    features = jax.random.normal(k_feat, (num_voxels, C_in), jnp.float32)
    coords_b = jax.random.randint(k_coord, (num_voxels, 1), 0, batch_size)
    coords_d = jax.random.randint(jax.random.fold_in(k_coord, 1),
                                  (num_voxels, 1), 0, grid_shape[0])
    coords_h = jax.random.randint(jax.random.fold_in(k_coord, 2),
                                  (num_voxels, 1), 0, grid_shape[1])
    coords_w = jax.random.randint(jax.random.fold_in(k_coord, 3),
                                  (num_voxels, 1), 0, grid_shape[2])
    coordinates = jnp.concatenate(
        [coords_b, coords_d, coords_h, coords_w], axis=-1).astype(jnp.int32)

    model = CNN3DPallas(grid_shape, C_in, voxel_size, grid_bounds, k_w)
    out = model(features, coordinates, batch_size)

    for feat, xyz in out:
        jax.block_until_ready(feat)
        jax.block_until_ready(xyz)

    print("KERNEL_OK")
</pallas_src>

<mosaic_0001>
module attributes {stable_mosaic.version = 11 : i64} {
  func.func @_fused_conv_kernel(%arg0: i32, %arg1: memref<108x1024xbf16, #tpu.memory_space<vmem>>, %arg2: memref<16x108xbf16, #tpu.memory_space<vmem>>, %arg3: memref<16x1024xf32, #tpu.memory_space<vmem>>) attributes {dimension_semantics = [#tpu.dimension_semantics<parallel>], iteration_bounds = array<i64: 6>, scalar_prefetch = 0 : i64, scratch_operands = 0 : i64, tpu.core_type = #tpu.core_type<tc>, window_params = [{transform_indices = @transform_0, window_bounds = array<i64: 108, 1024>}, {pipeline_mode = #tpu.pipeline_mode<synchronous>, transform_indices = @transform_1, window_bounds = array<i64: 16, 108>}, {transform_indices = @transform_2, window_bounds = array<i64: 16, 1024>}]} {
    %c0 = arith.constant 0 : index
    %c0_0 = arith.constant 0 : index
    %0 = vector.load %arg2[%c0, %c0_0] : memref<16x108xbf16, #tpu.memory_space<vmem>>, vector<16x108xbf16>
    %c0_1 = arith.constant 0 : index
    %c0_2 = arith.constant 0 : index
    %1 = vector.load %arg1[%c0_1, %c0_2] : memref<108x1024xbf16, #tpu.memory_space<vmem>>, vector<108x1024xbf16>
    %cst = arith.constant dense<0.000000e+00> : vector<16x1024xf32>
    %2 = tpu.matmul %0, %1, %cst {dimension_numbers = #tpu.dot_dimension_numbers<[1], [0], [0], [1], [0, 0, 1, 1], [], []>} : vector<16x108xbf16>, vector<108x1024xbf16>, vector<16x1024xf32> -> vector<16x1024xf32>
    %c0_3 = arith.constant 0 : index
    %c0_4 = arith.constant 0 : index
    %3 = vector.load %arg3[%c0_3, %c0_4] : memref<16x1024xf32, #tpu.memory_space<vmem>>, vector<16x1024xf32>
    tpu.vector_store %arg3[%c0_3, %c0_4], %2 {strides = array<i32>} : memref<16x1024xf32, #tpu.memory_space<vmem>>, vector<16x1024xf32>,
    return
  }
  func.func @transform_0(%arg0: i32) -> (i32, i32) {
    %c0_i32 = arith.constant 0 : i32
    %c0_i32_0 = arith.constant 0 : i32
    return %c0_i32, %arg0 : i32, i32
  }
  func.func @transform_1(%arg0: i32) -> (i32, i32) {
    %c0_i32 = arith.constant 0 : i32
    %c0_i32_0 = arith.constant 0 : i32
    %c0_i32_1 = arith.constant 0 : i32
    return %c0_i32, %c0_i32_0 : i32, i32
  }
  func.func @transform_2(%arg0: i32) -> (i32, i32) {
    %c0_i32 = arith.constant 0 : i32
    %c0_i32_0 = arith.constant 0 : i32
    return %c0_i32, %arg0 : i32, i32
  }
}

</mosaic_0001>

<bundles_post_ra>
// kernel: tpu_custom_call.1
= control target key start
LH: loop header
LB: loop body
LE: loop exit
PB: predicated region body
PF: predicated region fallthrough
CT: control target
= control target key end

     0   :  { %7 = vsyncpa [#allocation3], 0  ;;  %s1603_s0 = inlined_call_operand.hbm [shape: bf16[108,6144], index: 0, kind: input, shape index: {}]   ;;  %s1604_s1 = inlined_call_operand.hbm [shape: bf16[16,108], index: 1, kind: input, shape index: {}]   ;;  %s1605_s2 = inlined_call_operand.hbm [shape: f32[16,6144], index: 2, kind: output, shape index: {}]  }
   0x1   :  { %9 = vsyncpa [#allocation3 + $0x1], 0 }
   0x2   :  { %10 = vsyncpa [#allocation6], 0 }
   0x3   :  { %11 = vsyncpa [#allocation4], 0 }
   0x4   :  { %13 = vsyncpa [#allocation4 + $0x1], 0  ;;  %s1307_s9 = smov 0   ;;  %s1309_s10 = smov 0  }
   0x5   :  { %s1311_s11 = smov 0   ;;  %s1313_s12 = smov 0  }
   0x6 LB: > { %s1328_s13 = sadd.s32 4294967295, %s1281_s12   ;;  %s775_s14 = sadd.s32 4294967294, %s1281_s12   ;;  %s1281_s12 = sphi %s1313_s12, %s1614_s12   ;;  %s1277_s11 = sphi %s1311_s11, %s1613_s11   ;;  %s1273_s10 = sphi %s1309_s10, %s1612_s10   ;;  %s1269_s9 = sphi %s1307_s9, %s1611_s9  }
   0x7   : > { %p39_p0 = scmp.ne.s32.totalorder %s1273_s10, %s1269_s9  ;;  %p40_p1 = scmp.eq.s32.totalorder %s1328_s13, 0 }
   0x8   : > { %p84_p2 = scmp.eq.s32.totalorder %s1328_s13, 5  ;;  %p90_p3 = scmp.eq.s32.totalorder %s775_s14, 5 }
   0x9   : > { %p1337_p4 = por %p40_p1, %p39_p0  ;;  %p776_p5 = scmp.ge.s32.totalorder %s1281_s12, 1 }
   0xa   : > { %p1342_p6 = por %p90_p3, %p39_p0  ;;  %p97_p7 = scmp.lt.s32.totalorder %s1281_s12, 7 }
   0xb   : > { %s108_s19 = sshll.u32 %s1604_s1, 4  ;;  %s1283_s21 = smov [#allocation5]   ;;  %s109_s19 = int_to_ptr.hbm [resolvable:$true] %s108_s19 }
   0xc   : > { %p1350_p8 = pnand %p776_p5, %p97_p7  ;;  %s110_s22 = sshll.u32 %s1283_s21, 4  ;;  %s111_s22 = int_to_ptr.vmem [resolvable:$true] %s110_s22 }
   0xd   : > { %s1359_s23 = sadd.s32 1, %s1281_s12   ;;  %s1284_s24 = smov 64  }
   0xe   : > { %p1094_p9 = pneg %p1350_p8  ;;  %s1285_s25 = smov 4  }
   0xf   : > { %s23_s26 = ssub.s32 %s1281_s12, %s1359_s23  ;;  %s26_s27 = sadd.s32 1, %s1277_s11 }
  0x10   : > { %p1095_p10 = pnand %p1094_p9, %p40_p1  ;;  %p24_p11 = scmp.eq.s32.totalorder %s23_s26, 0 }
  0x11   : > { %p33_p12 = scmp.ne.s32.totalorder %s1277_s11, %s1273_s10  ;;  %p34_p13 = scmp.eq.s32.totalorder %s1281_s12, 0 }
  0x12   : > { %1097 = dma.hbm_to_vmem [thread:$0]  (!%p1095_p10), %s109_s19, 128, %s111_s22, [#allocation6], %s1284_s24, %s1284_s24, %s1285_s25  }
  0x13   : > { %p1107_p0 = scmp.lt.s32.totalorder %s1281_s12, 6  ;;  %p35_p3 = por %p34_p13, %p33_p12 }
  0x14   : > { %s1369_s28 = scalar_select %p24_p11, %s1277_s11, %s26_s27  }
  0x15   : > { %p1373_p5 = por %p84_p2, %p33_p12  ;;  %s124_s30 = sand.u32 1, %s1277_s11  }
  0x16   : > { %s1025_s3 = sshll.u32 %s1281_s12, 5  ;;  %s1084_s4 = smul.u32 448, %s124_s30 }
  0x17   : > { %s133_s7 = scalar_lea.hbm %s1603_s0, %s1025_s3  ;;  %p1382_p7 = pnand %p1107_p0, %p35_p3 }
  0x18   : > { %s134_s14 = sshll.u32 %s133_s7, 4  ;;  %s128_s17 = scalar_lea.vmem [#allocation2], %s1084_s4  ;;  %s135_s14 = int_to_ptr.hbm [resolvable:$true] %s134_s14 }
  0x19   : > { %s136_s18 = sshll.u32 %s128_s17, 4  ;;  %s125_s19 = scalar_lea.sflag [#allocation3], %s124_s30  ;;  %s137_s18 = int_to_ptr.vmem [resolvable:$true] %s136_s18 }
  0x1a   : > { %s1181_s21 = sshra.s32 %s135_s14, 4  ;;  %p1185_p9 = pneg %p1382_p7  ;;  %s1182_s21 = int_to_ptr.hbm [resolvable:$true] %s1181_s21 }
  0x1b   : > { %s1183_s22 = scalar_lea.hbm %s1182_s21, 448  ;;  %s1188_s26 = scalar_lea.hbm %s1603_s0, 2688 }
  0x1c   : > { %p1184_p2 = scmp.ne.s32.totalorder %s1182_s21, %s1183_s22  ;;  %p1189_p12 = scmp.lt.s32.totalorder %s1182_s21, %s1603_s0 }
  0x1d   : > { %p1190_p13 = scmp.lt.s32.totalorder %s1188_s26, %s1183_s22 }
  0x1e   : > { %p1186_p10 = pnand %p1185_p9, %p1184_p2 }
  0x1f   : > { %p1191_p0 = por %p1190_p13, %p1189_p12 }
  0x20   : > { %p1187_p11 = pneg %p1186_p10 }
  0x22   : > { %p1192_p3 = pnand %p1191_p0, %p1187_p11 }
  0x24   : > { %1195 = shalt.err (!%p1192_p3)
}
  0x25   : > { %s1286_s30 = smov 3072   ;;  %s1287_s4 = smov 512  }
  0x26   : > { %s1288_s5 = smov 32   ;;  %148 = sbr.rel (%p1350_p8) target bundleno = 254 (0xfe), region = 28 }
  0x27   : > { %1101 = dma.hbm_to_vmem [thread:$0]  (!%p1382_p7), %s135_s14, 7168, %s137_s18, %s125_s19, %s1286_s30, %s1287_s4, %s1288_s5  }
  0x28   : > { %s1399_s6 = sand.u32 (!%p1350_p8), 1, %s1273_s10  }
  0x29   : > { %s1085_s7 = smul.u32 (!%p1350_p8), 448, %s1399_s6  ;;  %s151_s17 = scalar_lea.sflag (!%p1350_p8), [#allocation3], %s1399_s6 }
  0x2b   : > { %s1403_s21 = scalar_lea.vmem [#allocation2], %s1085_s7 }
  0x2c   : > { %1256 = dma.done.wait (%p1337_p4), %s151_s17, 7168  }
  0x2d   : > { %1258 = vsyncadd (%p1337_p4), %s151_s17, 4294960128 }
  0x2e   : > { %1260 = dma.done.wait (%p40_p1), [#allocation6], 128  }
  0x2f   : > { %1262 = vsyncadd (%p40_p1), [#allocation6], 4294967168  ;;  %vm523_vm0 = vcmask 1045504   ;;  %v982_v0 = vld [vmem:[%s1403_s21 + $0x180] sm:$0xf]  ;;  %vm519_vm1 = vcmask 883712  }
  0x30   : > { %v1079_v1 = vld [vmem:[%s1403_s21 + $0x19c] sm:$0x30]  ;;  %v1075_v2 = vld [vmem:[%s1403_s21 + $0x184] sm:$0xf]  ;;  %v990_v5 = vld [vmem:[%s1403_s21 + $0x188] sm:$0xf] }
  0x31   : > { %v983_v3 = vor.u32 %v1079_v1, %v982_v0  ;;  %v984_v4 = vld [vmem:[%s1403_s21 + $0x1a0] sm:$0x30]  ;;  %v1080_v6 = vld [vmem:[%s1403_s21 + $0x1a4] sm:$0x30]  ;;  %v1076_v9 = vld [vmem:[%s1403_s21 + $0x18c] sm:$0xf] }
  0x32   : > { %v987_v7 = vor.u32 %v1075_v2, %v984_v4  ;;  %v991_v8 = vor.u32 %v1080_v6, %v990_v5  ;;  %v992_v10 = vld [vmem:[%s1403_s21 + $0x1a8] sm:$0x30]  ;;  %v950_v11 = vld [vmem:[%s1403_s21 + $0x140] sm:$0xf]  ;;  %v1067_v15 = vld [vmem:[%s1403_s21 + $0x144] sm:$0xf] }
  0x33   : > { %v525_v12 = vsel %vm523_vm0, %v983_v3, 0  ;;  %v995_v13 = vor.u32 %v1076_v9, %v992_v10  ;;  %v1071_v14 = vld [vmem:[%s1403_s21 + $0x15c] sm:$0xf0]  ;;  %v952_v19 = vld [vmem:[%s1403_s21 + $0x160] sm:$0xf0]  ;;  %s783_s15 = sshll.u32 %s1399_s6, 7 }
  0x34   : > { %549 = vmatpush.bf16.msra.mxu0 %v525_v12  ;;  %v528_v16 = vsel %vm523_vm0, %v987_v7, 0  ;;  %v531_v17 = vsel %vm523_vm0, %v991_v8, 0  ;;  %v951_v18 = vor.u32 %v1071_v14, %v950_v11  ;;  %v958_v20 = vld [vmem:[%s1403_s21 + $0x148] sm:$0xf]  ;;  %v955_v22 = vor.u32 %v1067_v15, %v952_v19  ;;  %v1068_v24 = vld [vmem:[%s1403_s21 + $0x14c] sm:$0xf] }
  0x35   : > { %563 = vmatpush.bf16.msra.mxu1 %v528_v16  ;;  %577 = vmatpush.bf16.msra.mxu2 %v531_v17  ;;  %v534_v21 = vsel %vm523_vm0, %v995_v13, 0  ;;  %v1072_v23 = vld [vmem:[%s1403_s21 + $0x164] sm:$0xf0]  ;;  %v960_v26 = vld [vmem:[%s1403_s21 + $0x168] sm:$0xf0]  ;;  %s1552_s20 = scalar_lea.vmem [#allocation7], %s783_s15 }
  0x36   : > { %591 = vmatpush.bf16.msra.mxu3 %v534_v21  ;;  %v959_v25 = vor.u32 %v1072_v23, %v958_v20  ;;  %v918_v27 = vld [vmem:[%s1403_s21 + $0x100] sm:$0xf]  ;;  %v963_v29 = vor.u32 %v1068_v24, %v960_v26  ;;  %v1059_v30 = vld [vmem:[%s1403_s21 + $0x104] sm:$0xf]  ;;  %v926_v32 = vld [vmem:[%s1403_s21 + $0x108] sm:$0xf] }
  0x37   : > { %v1063_v28 = vld [vmem:[%s1403_s21 + $0x11c] sm:$0xf0]  ;;  %v920_v31 = vld [vmem:[%s1403_s21 + $0x120] sm:$0xf0]  ;;  %v1064_v34 = vld [vmem:[%s1403_s21 + $0x124] sm:$0xf0] }
  0x38   : > { %550 = vmatpush.bf16.msra.mxu0 %v951_v18  ;;  %v919_v33 = vor.u32 %v1063_v28, %v918_v27  ;;  %v1060_v35 = vld [vmem:[%s1403_s21 + $0x10c] sm:$0xf]  ;;  %v923_v37 = vor.u32 %v1059_v30, %v920_v31  ;;  %v927_v38 = vor.u32 %v1064_v34, %v926_v32  ;;  %v886_v39 = vld [vmem:[%s1403_s21 + $0xc0] sm:$0xf]  ;;  %v1051_v41 = vld [vmem:[%s1403_s21 + $0xc4] sm:$0xf] }
  0x39   : > { %v928_v36 = vld [vmem:[%s1403_s21 + $0x128] sm:$0xf0]  ;;  %564 = vmatpush.bf16.msra.mxu1 %v955_v22  ;;  %578 = vmatpush.bf16.msra.mxu2 %v959_v25  ;;  %v1055_v40 = vld [vmem:[%s1403_s21 + $0xdc] sm:$0xf0]  ;;  %v888_v43 = vld [vmem:[%s1403_s21 + $0xe0] sm:$0xf0] }
  0x3a   : > { %592 = vmatpush.bf16.msra.mxu3 %v963_v29  ;;  %v931_v42 = vor.u32 %v1060_v35, %v928_v36  ;;  %v894_v44 = vld [vmem:[%s1403_s21 + $0xc8] sm:$0xf]  ;;  %v1052_v46 = vld [vmem:[%s1403_s21 + $0xcc] sm:$0xf]  ;;  %v887_v48 = vor.u32 %v1055_v40, %v886_v39  ;;  %v891_v49 = vor.u32 %v1051_v41, %v888_v43  ;;  %v854_v51 = vld [vmem:[%s1403_s21 + $0x80] sm:$0xf] }
  0x3b   : > { %v1056_v45 = vld [vmem:[%s1403_s21 + $0xe4] sm:$0xf0]  ;;  %v896_v47 = vld [vmem:[%s1403_s21 + $0xe8] sm:$0xf0]  ;;  %v1047_v52 = vld [vmem:[%s1403_s21 + $0x9c] sm:$0xf0] }
  0x3c   : > { %551 = vmatpush.bf16.msra.mxu0 %v919_v33  ;;  %v895_v50 = vor.u32 %v1056_v45, %v894_v44  ;;  %v1043_v53 = vld [vmem:[%s1403_s21 + $0x84] sm:$0xf]  ;;  %v899_v54 = vor.u32 %v1052_v46, %v896_v47  ;;  %v862_v56 = vld [vmem:[%s1403_s21 + $0x88] sm:$0xf]  ;;  %v1044_v58 = vld [vmem:[%s1403_s21 + $0x8c] sm:$0xf]  ;;  %v855_v60 = vor.u32 %v1047_v52, %v854_v51 }
  0x3d   : > { %565 = vmatpush.bf16.msra.mxu1 %v923_v37  ;;  %579 = vmatpush.bf16.msra.mxu2 %v927_v38  ;;  %v856_v55 = vld [vmem:[%s1403_s21 + $0xa0] sm:$0xf0]  ;;  %v1048_v57 = vld [vmem:[%s1403_s21 + $0xa4] sm:$0xf0]  ;;  %v864_v59 = vld [vmem:[%s1403_s21 + $0xa8] sm:$0xf0] }
  0x3e   : > { %593 = vmatpush.bf16.msra.mxu3 %v931_v42  ;;  %v822_v61 = vld [vmem:[%s1403_s21 + $0x40] sm:$0xf]  ;;  %v859_v62 = vor.u32 %v1043_v53, %v856_v55  ;;  %v863_v63 = vor.u32 %v1048_v57, %v862_v56  ;;  %v1035_v1 = vld [vmem:[%s1403_s21 + $0x44] sm:$0xf]  ;;  %v867_v3 = vor.u32 %v1044_v58, %v864_v59  ;;  %v830_v4 = vld [vmem:[%s1403_s21 + $0x48] sm:$0xf] }
  0x3f   : > { %v1039_v0 = vld [vmem:[%s1403_s21 + $0x5c] sm:$0xf0]  ;;  %v824_v2 = vld [vmem:[%s1403_s21 + $0x60] sm:$0xf0]  ;;  %v1040_v5 = vld [vmem:[%s1403_s21 + $0x64] sm:$0xf0] }
  0x40   : > { %552 = vmatpush.bf16.msra.mxu0 %v887_v48  ;;  %v1036_v6 = vld [vmem:[%s1403_s21 + $0x4c] sm:$0xf]  ;;  %v790_v8 = vld [vmem:[%s1403_s21] sm:$0xf]  ;;  %v823_v10 = vor.u32 %v1039_v0, %v822_v61  ;;  %v1027_v11 = vld [vmem:[%s1403_s21 + $0x4] sm:$0xf]  ;;  %v827_v17 = vor.u32 %v1035_v1, %v824_v2  ;;  %v831_v18 = vor.u32 %v1040_v5, %v830_v4 }
  0x41   : > { %566 = vmatpush.bf16.msra.mxu1 %v891_v49  ;;  %580 = vmatpush.bf16.msra.mxu2 %v895_v50  ;;  %v832_v7 = vld [vmem:[%s1403_s21 + $0x68] sm:$0xf0]  ;;  %v1031_v9 = vld [vmem:[%s1403_s21 + $0x1c] sm:$0xf0]  ;;  %v792_v12 = vld [vmem:[%s1403_s21 + $0x20] sm:$0xf0] }
  0x42   : > { %594 = vmatpush.bf16.msra.mxu3 %v899_v54  ;;  %v798_v13 = vld [vmem:[%s1403_s21 + $0x8] sm:$0xf]  ;;  %v998_v14 = vld [vmem:[%s1403_s21 + $0x190] sm:$0xf]  ;;  %v1077_v16 = vld [vmem:[%s1403_s21 + $0x194] sm:$0xf]  ;;  %v835_v22 = vor.u32 %v1036_v6, %v832_v7  ;;  %v791_v29 = vor.u32 %v1031_v9, %v790_v8  ;;  %v795_v32 = vor.u32 %v1027_v11, %v792_v12 }
  0x43   : > { %v1081_v15 = vld [vmem:[%s1403_s21 + $0x1ac] sm:$0x30]  ;;  %v1000_v19 = vld [vmem:[%s1403_s21 + $0x1b0] sm:$0x30]  ;;  %v1006_v20 = vld [vmem:[%s1403_s21 + $0x198] sm:$0xf] }
  0x44   : > { %553 = vmatpush.bf16.msra.mxu0 %v855_v60  ;;  %v1082_v21 = vld [vmem:[%s1403_s21 + $0x1b4] sm:$0x30]  ;;  %v1032_v23 = vld [vmem:[%s1403_s21 + $0x24] sm:$0xf0]  ;;  %v1078_v24 = vld [vmem:[%s1403_s21 + $0x19c] sm:$0xf]  ;;  %v999_v28 = vor.u32 %v1081_v15, %v998_v14  ;;  %v1003_v30 = vor.u32 %v1077_v16, %v1000_v19 }
  0x45   : > { %567 = vmatpush.bf16.msra.mxu1 %v859_v62  ;;  %581 = vmatpush.bf16.msra.mxu2 %v863_v63  ;;  %v1008_v25 = vld [vmem:[%s1403_s21 + $0x1b8] sm:$0x30]  ;;  %v1028_v26 = vld [vmem:[%s1403_s21 + $0xc] sm:$0xf]  ;;  %v1007_v31 = vor.u32 %v1082_v21, %v1006_v20  ;;  %v799_v33 = vor.u32 %v1032_v23, %v798_v13  ;;  %v966_v36 = vld [vmem:[%s1403_s21 + $0x150] sm:$0xf] }
  0x46   : > { %595 = vmatpush.bf16.msra.mxu3 %v867_v3  ;;  %v800_v27 = vld [vmem:[%s1403_s21 + $0x28] sm:$0xf0]  ;;  %v1011_v34 = vor.u32 %v1078_v24, %v1008_v25  ;;  %v1073_v37 = vld [vmem:[%s1403_s21 + $0x16c] sm:$0xf0]  ;;  %v537_v38 = vsel %vm523_vm0, %v999_v28, 0  ;;  %v1484_v39 = vld [vmem:[#allocation5] sm:$0xff] }
  0x47   : > { %v803_v35 = vor.u32 %v1028_v26, %v800_v27  ;;  %v1069_v40 = vld [vmem:[%s1403_s21 + $0x154] sm:$0xf]  ;;  %v540_v42 = vsel %vm523_vm0, %v1003_v30, 0  ;;  %v543_v43 = vsel %vm523_vm0, %v1007_v31, 0  ;;  %v974_v44 = vld [vmem:[%s1403_s21 + $0x158] sm:$0xf]  ;;  %v967_v49 = vor.u32 %v1073_v37, %v966_v36 }
  0x48   : > { %554 = vmatpush.bf16.msra.mxu0 %v823_v10  ;;  %v968_v41 = vld [vmem:[%s1403_s21 + $0x170] sm:$0xf0]  ;;  %v1074_v45 = vld [vmem:[%s1403_s21 + $0x174] sm:$0xf0]  ;;  %v546_v46 = vsel %vm523_vm0, %v1011_v34, 0  ;;  %s1083_s8 = sshll.u32 %s1328_s13, 6 }
  0x49   : > { %568 = vmatpush.bf16.msra.mxu1 %v827_v17  ;;  %582 = vmatpush.bf16.msra.mxu2 %v831_v18  ;;  %v1070_v47 = vld [vmem:[%s1403_s21 + $0x15c] sm:$0xf]  ;;  %v971_v50 = vor.u32 %v1069_v40, %v968_v41  ;;  %v975_v51 = vor.u32 %v1074_v45, %v974_v44  ;;  %v934_v52 = vld [vmem:[%s1403_s21 + $0x110] sm:$0xf]  ;;  %v1061_v54 = vld [vmem:[%s1403_s21 + $0x114] sm:$0xf]  ;;  %s688_s19 = scalar_lea.hbm %s1605_s2, %s1083_s8 }
  0x4a   : > { %596 = vmatpush.bf16.msra.mxu3 %v835_v22  ;;  %v976_v48 = vld [vmem:[%s1403_s21 + $0x178] sm:$0xf0]  ;;  %v1065_v53 = vld [vmem:[%s1403_s21 + $0x12c] sm:$0xf0]  ;;  %v936_v56 = vld [vmem:[%s1403_s21 + $0x130] sm:$0xf0] }
  0x4b   : > { %v979_v55 = vor.u32 %v1070_v47, %v976_v48  ;;  %v942_v57 = vld [vmem:[%s1403_s21 + $0x118] sm:$0xf]  ;;  %v1062_v59 = vld [vmem:[%s1403_s21 + $0x11c] sm:$0xf]  ;;  %v935_v61 = vor.u32 %v1065_v53, %v934_v52  ;;  %v939_v62 = vor.u32 %v1061_v54, %v936_v56  ;;  %v902_v0 = vld [vmem:[%s1403_s21 + $0xd0] sm:$0xf] }
  0x4c   : > { %555 = vmatpush.bf16.msra.mxu0 %v791_v29  ;;  %v1066_v58 = vld [vmem:[%s1403_s21 + $0x134] sm:$0xf0]  ;;  %v944_v60 = vld [vmem:[%s1403_s21 + $0x138] sm:$0xf0]  ;;  %v1057_v1 = vld [vmem:[%s1403_s21 + $0xec] sm:$0xf0] }
  0x4d   : > { %569 = vmatpush.bf16.msra.mxu1 %v795_v32  ;;  %583 = vmatpush.bf16.msra.mxu2 %v799_v33  ;;  %v943_v63 = vor.u32 %v1066_v58, %v942_v57  ;;  %v1053_v2 = vld [vmem:[%s1403_s21 + $0xd4] sm:$0xf]  ;;  %v947_v3 = vor.u32 %v1062_v59, %v944_v60  ;;  %v910_v5 = vld [vmem:[%s1403_s21 + $0xd8] sm:$0xf]  ;;  %v1054_v7 = vld [vmem:[%s1403_s21 + $0xdc] sm:$0xf]  ;;  %v903_v9 = vor.u32 %v1057_v1, %v902_v0 }
  0x4e   : > { %597 = vmatpush.bf16.msra.mxu3 %v803_v35  ;;  %v904_v4 = vld [vmem:[%s1403_s21 + $0xf0] sm:$0xf0]  ;;  %v1058_v6 = vld [vmem:[%s1403_s21 + $0xf4] sm:$0xf0]  ;;  %v912_v8 = vld [vmem:[%s1403_s21 + $0xf8] sm:$0xf0] }
  0x4f   : > { %1012 = vmatmul.msk.bf16.vlgmr.msra.gmra.mxu0 %vm519_vm1, %v1484_v39  ;;  %v907_v10 = vor.u32 %v1053_v2, %v904_v4  ;;  %v911_v11 = vor.u32 %v1058_v6, %v910_v5  ;;  %v870_v12 = vld [vmem:[%s1403_s21 + $0x90] sm:$0xf]  ;;  %v1045_v14 = vld [vmem:[%s1403_s21 + $0x94] sm:$0xf]  ;;  %v915_v15 = vor.u32 %v1054_v7, %v912_v8  ;;  %v878_v17 = vld [vmem:[%s1403_s21 + $0x98] sm:$0xf] }
  0x50   : > { %605 = vmatpush.bf16.msrb.mxu0 %v537_v38  ;;  %1014 = vmatmul.msk.bf16.vlgmr.msra.gmra.mxu2 %vm519_vm1, %v1484_v39  ;;  %v1049_v13 = vld [vmem:[%s1403_s21 + $0xac] sm:$0xf0]  ;;  %v872_v16 = vld [vmem:[%s1403_s21 + $0xb0] sm:$0xf0]  ;;  %v1050_v18 = vld [vmem:[%s1403_s21 + $0xb4] sm:$0xf0] }
  0x51   : > { %619 = vmatpush.bf16.msrb.mxu1 %v540_v42  ;;  %633 = vmatpush.bf16.msrb.mxu2 %v543_v43  ;;  %v1046_v19 = vld [vmem:[%s1403_s21 + $0x9c] sm:$0xf]  ;;  %v871_v21 = vor.u32 %v1049_v13, %v870_v12  ;;  %v875_v22 = vor.u32 %v1045_v14, %v872_v16  ;;  %v879_v23 = vor.u32 %v1050_v18, %v878_v17  ;;  %v838_v24 = vld [vmem:[%s1403_s21 + $0x50] sm:$0xf]  ;;  %v1037_v26 = vld [vmem:[%s1403_s21 + $0x54] sm:$0xf] }
  0x52   : > { %647 = vmatpush.bf16.msrb.mxu3 %v546_v46  ;;  %1013 = vmatmul.msk.bf16.vlgmr.msra.gmra.mxu1 %vm519_vm1, %v1484_v39  ;;  %v880_v20 = vld [vmem:[%s1403_s21 + $0xb8] sm:$0xf0]  ;;  %v1041_v25 = vld [vmem:[%s1403_s21 + $0x6c] sm:$0xf0]  ;;  %v840_v28 = vld [vmem:[%s1403_s21 + $0x70] sm:$0xf0] }
  0x53   : > { %1015 = vmatmul.msk.bf16.vlgmr.msra.gmra.mxu3 %vm519_vm1, %v1484_v39  ;;  %v883_v27 = vor.u32 %v1046_v19, %v880_v20  ;;  %v846_v29 = vld [vmem:[%s1403_s21 + $0x58] sm:$0xf]  ;;  %v1038_v31 = vld [vmem:[%s1403_s21 + $0x5c] sm:$0xf]  ;;  %v839_v33 = vor.u32 %v1041_v25, %v838_v24  ;;  %v843_v34 = vor.u32 %v1037_v26, %v840_v28  ;;  %v806_v36 = vld [vmem:[%s1403_s21 + $0x10] sm:$0xf] }
  0x54   : > { %606 = vmatpush.bf16.msrb.mxu0 %v967_v49  ;;  %v1042_v30 = vld [vmem:[%s1403_s21 + $0x74] sm:$0xf0]  ;;  %v848_v32 = vld [vmem:[%s1403_s21 + $0x78] sm:$0xf0]  ;;  %v1033_v37 = vld [vmem:[%s1403_s21 + $0x2c] sm:$0xf0] }
  0x55   : > { %620 = vmatpush.bf16.msrb.mxu1 %v971_v50  ;;  %634 = vmatpush.bf16.msrb.mxu2 %v975_v51  ;;  %v847_v35 = vor.u32 %v1042_v30, %v846_v29  ;;  %v1029_v38 = vld [vmem:[%s1403_s21 + $0x14] sm:$0xf]  ;;  %v851_v40 = vor.u32 %v1038_v31, %v848_v32  ;;  %v814_v42 = vld [vmem:[%s1403_s21 + $0x18] sm:$0xf]  ;;  %v1030_v44 = vld [vmem:[%s1403_s21 + $0x1c] sm:$0xf]  ;;  %v807_v46 = vor.u32 %v1033_v37, %v806_v36 }
  0x56   : > { %648 = vmatpush.bf16.msrb.mxu3 %v979_v55  ;;  %v808_v41 = vld [vmem:[%s1403_s21 + $0x30] sm:$0xf0]  ;;  %v1034_v43 = vld [vmem:[%s1403_s21 + $0x34] sm:$0xf0]  ;;  %v816_v45 = vld [vmem:[%s1403_s21 + $0x38] sm:$0xf0] }
  0x57   : > { %v811_v47 = vor.u32 %v1029_v38, %v808_v41  ;;  %v815_v48 = vor.u32 %v1034_v43, %v814_v42  ;;  %v819_v49 = vor.u32 %v1030_v44, %v816_v45  ;;  %s689_s22 = sshll.u32 %s1552_s20, 4  ;;  %s691_s24 = sshll.u32 %s688_s19, 4  ;;  %s690_s22 = int_to_ptr.vmem [resolvable:$true] %s689_s22  ;;  %s692_s24 = int_to_ptr.hbm [resolvable:$true] %s691_s24 }
  0x58   : > { %607 = vmatpush.bf16.msrb.mxu0 %v935_v61  ;;  %s677_s13 = scalar_lea.sflag [#allocation4], %s1399_s6  ;;  %s1225_s25 = sshra.s32 %s692_s24, 4  ;;  %s1226_s25 = int_to_ptr.hbm [resolvable:$true] %s1225_s25 }
  0x59   : > { %621 = vmatpush.bf16.msrb.mxu1 %v939_v62  ;;  %635 = vmatpush.bf16.msrb.mxu2 %v943_v63  ;;  %s1227_s26 = scalar_lea.hbm %s1226_s25, 128  ;;  %s1231_s30 = scalar_lea.hbm %s1605_s2, 768 }
  0x5a   : > { %649 = vmatpush.bf16.msrb.mxu3 %v947_v3  ;;  %p1228_p1 = scmp.ne.s32.totalorder %s1226_s25, %s1227_s26  ;;  %p1232_p7 = scmp.lt.s32.totalorder %s1226_s25, %s1605_s2 }
  0x5b   : > { %p1233_p2 = scmp.lt.s32.totalorder %s1231_s30, %s1227_s26 }
  0x5c   : > { %608 = vmatpush.bf16.msrb.mxu0 %v903_v9  ;;  %p1229_p4 = pnand %p1228_p1, %p1373_p5 }
  0x5d   : > { %622 = vmatpush.bf16.msrb.mxu1 %v907_v10  ;;  %636 = vmatpush.bf16.msrb.mxu2 %v911_v11  ;;  %p1234_p9 = por %p1233_p2, %p1232_p7 }
  0x5e   : > { %650 = vmatpush.bf16.msrb.mxu3 %v915_v15  ;;  %p1230_p8 = pneg %p1229_p4 }
  0x60   : > { %609 = vmatpush.bf16.msrb.mxu0 %v871_v21  ;;  %p1235_p10 = pnand %p1234_p9, %p1230_p8 }
  0x61   : > { %623 = vmatpush.bf16.msrb.mxu1 %v875_v22  ;;  %637 = vmatpush.bf16.msrb.mxu2 %v879_v23 }
  0x62   : > { %651 = vmatpush.bf16.msrb.mxu3 %v883_v27 }
  0x64   : > { %610 = vmatpush.bf16.msrb.mxu0 %v839_v33 }
  0x65   : > { %624 = vmatpush.bf16.msrb.mxu1 %v843_v34  ;;  %638 = vmatpush.bf16.msrb.mxu2 %v847_v35 }
  0x66   : > { %652 = vmatpush.bf16.msrb.mxu3 %v851_v40 }
  0x68   : > { %611 = vmatpush.bf16.msrb.mxu0 %v807_v46 }
  0x69   : > { %625 = vmatpush.bf16.msrb.mxu1 %v811_v47  ;;  %639 = vmatpush.bf16.msrb.mxu2 %v815_v48 }
  0x6a   : > { %653 = vmatpush.bf16.msrb.mxu3 %v819_v49 }
  0x6b   : > { %1016 = vmatmul.msk.bf16.vlgmr.msrb.gmra.mxu0 %vm519_vm1, %v1484_v39 }
  0x6c   : > { %1017 = vmatmul.msk.bf16.vlgmr.msrb.gmra.mxu1 %vm519_vm1, %v1484_v39  ;;  %1018 = vmatmul.msk.bf16.vlgmr.msrb.gmra.mxu2 %vm519_vm1, %v1484_v39 }
  0x6d   : > { %1019 = vmatmul.msk.bf16.vlgmr.msrb.gmra.mxu3 %vm519_vm1, %v1484_v39 }
  0xcc   : > { %v557_v50 = vpop.f32.mrf.mxu0 }
  0xcd   : > { %660 = vst [vmem:[%s1552_s20] sm:$0xff] %v557_v50 }
  0xcf   : > { %v571_v51 = vpop.f32.mrf.mxu1 }
  0xd0   : > { %661 = vst [vmem:[%s1552_s20 + $0x8] sm:$0xff] %v571_v51 }
  0xd3   : > { %v585_v52 = vpop.f32.mrf.mxu2 }
  0xd4   : > { %662 = vst [vmem:[%s1552_s20 + $0x10] sm:$0xff] %v585_v52  ;;  %v559_v53 = vpop.f32.mrf.mxu0 }
  0xd5   : > { %668 = vst [vmem:[%s1552_s20 + $0x40] sm:$0xff] %v559_v53 }
  0xd6   : > { %v599_v39 = vpop.f32.mrf.mxu3 }
  0xd7   : > { %663 = vst [vmem:[%s1552_s20 + $0x18] sm:$0xff] %v599_v39  ;;  %v573_v54 = vpop.f32.mrf.mxu1 }
  0xd8   : > { %669 = vst [vmem:[%s1552_s20 + $0x48] sm:$0xff] %v573_v54 }
  0xdb   : > { %v587_v55 = vpop.f32.mrf.mxu2 }
  0xdc   : > { %670 = vst [vmem:[%s1552_s20 + $0x50] sm:$0xff] %v587_v55 }
  0xde   : > { %v601_v56 = vpop.f32.mrf.mxu3 }
  0xdf   : > { %671 = vst [vmem:[%s1552_s20 + $0x58] sm:$0xff] %v601_v56 }
  0xe8   : > { %v613_v57 = vpop.f32.mrf.mxu0 }
  0xe9   : > { %664 = vst [vmem:[%s1552_s20 + $0x20] sm:$0xff] %v613_v57  ;;  %v627_v58 = vpop.f32.mrf.mxu1 }
  0xea   : > { %665 = vst [vmem:[%s1552_s20 + $0x28] sm:$0xff] %v627_v58 }
  0xef   : > { %v641_v59 = vpop.f32.mrf.mxu2 }
  0xf0   : > { %666 = vst [vmem:[%s1552_s20 + $0x30] sm:$0xff] %v641_v59  ;;  %v655_v60 = vpop.f32.mrf.mxu3  ;;  %v615_v61 = vpop.f32.mrf.mxu0 }
  0xf1   : > { %667 = vst [vmem:[%s1552_s20 + $0x38] sm:$0xff] %v655_v60  ;;  %v629_v62 = vpop.f32.mrf.mxu1 }
  0xf2   : > { %672 = vst [vmem:[%s1552_s20 + $0x60] sm:$0xff] %v615_v61 }
  0xf3   : > { %673 = vst [vmem:[%s1552_s20 + $0x68] sm:$0xff] %v629_v62 }
  0xf7   : > { %v643_v63 = vpop.f32.mrf.mxu2 }
  0xf8   : > { %674 = vst [vmem:[%s1552_s20 + $0x70] sm:$0xff] %v643_v63  ;;  %v657_v0 = vpop.f32.mrf.mxu3 }
  0xf9   : > { %675 = vst [vmem:[%s1552_s20 + $0x78] sm:$0xff] %v657_v0 }
  0xfa   : > { %1238 = shalt.err (!%p1235_p10)
}
  0xfb   : > { %s1289_s6 = smov 1024   ;;  %s1290_s7 = smov 6144  }
  0xfc   : > { %s1291_s17 = smov 64  }
  0xfd   : > { %1092 = dma.vmem_to_hbm [thread:$0]  (%p1373_p5), %s690_s22, 2048, %s692_s24, %s677_s13, %s1289_s6, %s1290_s7, %s1291_s17  }
  0xfe PF: > { %p1109_p11 = scmp.ge.s32.totalorder %s1281_s12, 2  ;;  %s706_s21 = sand.u32 1, %s1269_s9  }
  0xff   : > { %s707_s15 = scalar_lea.sflag [#allocation4], %s706_s21 }
 0x100   : > { %p1103_p12 = pnand %p1109_p11, %p1342_p6 }
 0x102   : > { %p1104_p13 = pneg %p1103_p12 }
 0x104   : > { %1264 = dma.done.wait (%p1104_p13), %s707_s15, 2048  }
 0x105   : > { %1266 = vsyncadd (%p1104_p13), %s707_s15, 4294965248  ;;  %p16_p0 = scmp.ge.s32.totalorder %s1359_s23, 8   ;;  %s1611_s9 = smov %s1273_s10 }
 0x106   : > { %s1612_s10 = smov %s1277_s11  ;;  %s1613_s11 = smov %s1369_s28 }
 0x107   : > { %s1614_s12 = smov %s1359_s23  ;;  %18 = sbr.rel (!%p16_p0) target bundleno = 6 (0x6), region = 77 }
 0x10c   :  { %713 = vsyncpa [#allocation3], 1 }
 0x10d   :  { %715 = vsyncpa [#allocation3 + $0x1], 1 }
 0x10e   :  { %716 = vsyncpa [#allocation6], 1 }
 0x10f   :  { %717 = vsyncpa [#allocation4], 1 }
 0x110   :  { %719 = vsyncpa [#allocation4 + $0x1], 1 }

</bundles_post_ra>
